<compile_context>
chip_gen: v7x
topology: tpu7x:2x2x1
jax: 0.10.0
libtpu: 0.0.40
codegen_flags: <defaults>
</compile_context>

<pallas_src>
import math

import jax
import jax.numpy as jnp
from jax import lax
from jax.experimental import pallas as pl
from jax.experimental.pallas import tpu as pltpu


_VMEM_LIMIT = 64 * 1024 * 1024   # explicit scoped-VMEM budget (tune per chip)


def _cparams(n_axes=1, vmem=True):
    return pltpu.CompilerParams(
        dimension_semantics=("parallel",) * n_axes,
        vmem_limit_bytes=_VMEM_LIMIT if vmem else None)


def _batch_tile(n, cap=32):
    """Tile for a 2nd-minor block dim: divisor of n that is a multiple of 8,
    else the full dim (always legal).  Drop `cap` to 8-16 on v7x (64MiB VMEM)."""
    if n <= cap:
        return n
    for c in range(cap, 7, -1):
        if c % 8 == 0 and n % c == 0:
            return c
    return n


# ---------------------------------------------------------------------------
# 1. Row-tiled matmul (all Linear / channels-last 1x1 projections)
#    optional per-input-feature affine prologue (folded BatchNorm) + bias/ReLU
# ---------------------------------------------------------------------------
_ROW_TILE = 512        # v5e/v6e sweet spot; shrink to 256 on v7x (64MiB VMEM)


def _matmul_kernel(act, has_bias, has_affine):
    def kernel(*refs):
        i = 0
        a_ref = refs[i]; i += 1
        w_ref = refs[i]; i += 1
        if has_affine:
            s_ref, t_ref = refs[i], refs[i + 1]; i += 2
        if has_bias:
            b_ref = refs[i]; i += 1
        o_ref = refs[i]

        a = a_ref[...]
        if has_affine:                       # folded BatchNorm prologue (f32)
            a = a * s_ref[...] + t_ref[...]
        acc = jnp.dot(a.astype(jnp.bfloat16), w_ref[...].astype(jnp.bfloat16),
                      preferred_element_type=jnp.float32)
        if has_bias:
            acc = acc + b_ref[...]
        if act == "relu":
            acc = jnp.maximum(acc, 0.0)
        o_ref[...] = acc.astype(o_ref.dtype)
    return kernel


def pallas_matmul(a, w, b=None, act="none", scale=None, shift=None):
    """a: [R, K] f32, w: [K, C] bf16, bias [C] -> [R, C] f32; row-tiled grid."""
    R, K = a.shape
    C = w.shape[1]
    tm = R if R <= _ROW_TILE else _ROW_TILE
    grid = (pl.cdiv(R, tm),)

    args = [a, w]
    in_specs = [pl.BlockSpec((tm, K), lambda i: (i, 0)),
                pl.BlockSpec((K, C), lambda i: (0, 0))]
    has_affine = scale is not None
    if has_affine:
        args += [scale.reshape(1, K).astype(jnp.float32),
                 shift.reshape(1, K).astype(jnp.float32)]
        in_specs += [pl.BlockSpec((1, K), lambda i: (0, 0))] * 2
    has_bias = b is not None
    if has_bias:
        args.append(b.reshape(1, C).astype(jnp.float32))
        in_specs.append(pl.BlockSpec((1, C), lambda i: (0, 0)))

    return pl.pallas_call(
        _matmul_kernel(act, has_bias, has_affine),
        out_shape=jax.ShapeDtypeStruct((R, C), jnp.float32),
        grid=grid,
        in_specs=in_specs,
        out_specs=pl.BlockSpec((tm, C), lambda i: (i, 0)),
        compiler_params=_cparams(1),
    )(*args)


def linear(x, W, b=None, act="none", scale=None, shift=None):
    shp = x.shape
    y = pallas_matmul(x.reshape(-1, shp[-1]), W, b, act, scale, shift)
    return y.reshape(shp[:-1] + (W.shape[1],))


# ---------------------------------------------------------------------------
# 2. Channels-first 1x1 conv with fused gLN / PReLU prologue + ReLU epilogue
#    x: [M, Cin, L] -> [M, Cout, L]; weight pre-transposed [Cout, Cin] (bf16)
# ---------------------------------------------------------------------------
def _conv_cf_kernel(has_gln, has_prelu, relu, eps):
    def kernel(*refs):
        x_ref, wt_ref = refs[0], refs[1]
        idx = 2
        if has_gln:
            g_ref, bb_ref = refs[idx], refs[idx + 1]
            idx += 2
        if has_prelu:
            a_ref = refs[idx]
            idx += 1
        o_ref = refs[idx]

        xx = x_ref[0]                                          # [Cin, L] f32
        if has_gln:                                            # GroupNorm(1, Cin)
            m = jnp.mean(jnp.mean(xx, axis=1, keepdims=True), axis=0, keepdims=True)
            msq = jnp.mean(jnp.mean(xx * xx, axis=1, keepdims=True),
                           axis=0, keepdims=True)
            var = jnp.maximum(msq - m * m, 0.0)
            xx = (xx - m) * lax.rsqrt(var + eps) * g_ref[...] + bb_ref[...]
        if has_prelu:
            xx = jnp.where(xx >= 0.0, xx, a_ref[...] * xx)
        y = jnp.dot(wt_ref[...].astype(jnp.bfloat16), xx.astype(jnp.bfloat16),
                    preferred_element_type=jnp.float32)        # [Cout, L]
        if relu:
            y = jnp.maximum(y, 0.0)
        o_ref[0] = y
    return kernel


def conv1x1_cf(x, Wt, *, gln=None, prelu_alpha=None, relu=False, eps=1e-8):
    M, Cin, L = x.shape
    Cout = Wt.shape[0]
    args = [x, Wt]
    in_specs = [pl.BlockSpec((1, Cin, L), lambda i: (i, 0, 0)),
                pl.BlockSpec((Cout, Cin), lambda i: (0, 0))]
    if gln is not None:
        g, b = gln
        args += [g.reshape(Cin, 1).astype(jnp.float32),
                 b.reshape(Cin, 1).astype(jnp.float32)]
        in_specs += [pl.BlockSpec((Cin, 1), lambda i: (0, 0)),
                     pl.BlockSpec((Cin, 1), lambda i: (0, 0))]
    if prelu_alpha is not None:
        args.append(jnp.asarray(prelu_alpha, jnp.float32).reshape(1, 1))
        in_specs.append(pl.BlockSpec((1, 1), lambda i: (0, 0)))
    return pl.pallas_call(
        _conv_cf_kernel(gln is not None, prelu_alpha is not None, relu, eps),
        out_shape=jax.ShapeDtypeStruct((M, Cout, L), jnp.float32),
        grid=(M,),
        in_specs=in_specs,
        out_specs=pl.BlockSpec((1, Cout, L), lambda i: (i, 0, 0)),
        compiler_params=_cparams(1),
    )(*args)


# ---------------------------------------------------------------------------
# 3. GlobalLayerNorm / GroupNorm(1,*) + residual add (single-pass statistics)
# ---------------------------------------------------------------------------
def gln_add(y, res, gamma, beta, eps=1e-8):
    """out = gamma*gLN(y)+beta + res; y, res: [Bn, C, L]."""
    Bn, C, L = y.shape
    g = gamma.reshape(C, 1).astype(jnp.float32)
    b = beta.reshape(C, 1).astype(jnp.float32)

    def kernel(y_ref, r_ref, g_ref, b_ref, o_ref):
        yy = y_ref[0]
        m = jnp.mean(jnp.mean(yy, axis=1, keepdims=True), axis=0, keepdims=True)
        msq = jnp.mean(jnp.mean(yy * yy, axis=1, keepdims=True), axis=0, keepdims=True)
        var = jnp.maximum(msq - m * m, 0.0)
        o_ref[0] = ((yy - m) * lax.rsqrt(var + eps) * g_ref[...] + b_ref[...]
                    + r_ref[0])

    blk = pl.BlockSpec((1, C, L), lambda i: (i, 0, 0))
    return pl.pallas_call(
        kernel,
        out_shape=jax.ShapeDtypeStruct((Bn, C, L), jnp.float32),
        grid=(Bn,),
        in_specs=[blk, blk,
                  pl.BlockSpec((C, 1), lambda i: (0, 0)),
                  pl.BlockSpec((C, 1), lambda i: (0, 0))],
        out_specs=blk,
        compiler_params=_cparams(1),
    )(y, res, g, b)


# ---------------------------------------------------------------------------
# 4. Fully fused VisualConv1D block (channels-last, one kernel per sample)
# ---------------------------------------------------------------------------
def _visual_block_kernel(T, eps):
    use_roll = (T % 8 == 0)       # sublane-aligned: use XLU roll + masks

    def kernel(x_ref, w1_ref, dsw_ref, w2_ref, g0_ref, b0_ref, g1_ref, b1_ref,
               g2_ref, b2_ref, a_ref, o_ref):
        x = x_ref[0]                                           # [T, V] channels-last

        def gln(y, g, b):
            m = jnp.mean(jnp.mean(y, axis=1, keepdims=True), axis=0, keepdims=True)
            msq = jnp.mean(jnp.mean(y * y, axis=1, keepdims=True),
                           axis=0, keepdims=True)
            var = jnp.maximum(msq - m * m, 0.0)
            return (y - m) * lax.rsqrt(var + eps) * g + b

        h = gln(jnp.maximum(x, 0.0), g0_ref[...], b0_ref[...])
        h = jnp.maximum(
            jnp.dot(h.astype(jnp.bfloat16), w1_ref[...].astype(jnp.bfloat16),
                    preferred_element_type=jnp.float32), 0.0)
        h = gln(h, g1_ref[...], b1_ref[...])

        # depthwise conv (k=3, zero pad) along time: shifted views, no scratch
        w = dsw_ref[...]                                       # [3, Vh] f32
        if use_roll:
            tidx = lax.broadcasted_iota(jnp.int32, h.shape, 0)
            h_prev = jnp.where(tidx == 0, 0.0, pltpu.roll(h, 1, 0))
            h_next = jnp.where(tidx == T - 1, 0.0, pltpu.roll(h, T - 1, 0))
        else:
            zrow = jnp.zeros((1, h.shape[1]), jnp.float32)
            h_prev = jnp.concatenate([zrow, h[:T - 1, :]], axis=0)
            h_next = jnp.concatenate([h[1:, :], zrow], axis=0)
        h = h_prev * w[0:1, :] + h * w[1:2, :] + h_next * w[2:3, :]

        h = jnp.where(h >= 0.0, h, a_ref[...] * h)             # PReLU
        h = gln(h, g2_ref[...], b2_ref[...])
        y = jnp.dot(h.astype(jnp.bfloat16), w2_ref[...].astype(jnp.bfloat16),
                    preferred_element_type=jnp.float32)
        o_ref[0] = y + x                                       # residual
    return kernel


def visual_block(v, p, eps=1e-8):
    M, T, N = v.shape
    Vh = p["conv1x1_W"].shape[1]
    args = [v, p["conv1x1_W"], p["ds_w"], p["pw_W"],
            p["gln0_g"].reshape(1, N), p["gln0_b"].reshape(1, N),
            p["gln1_g"].reshape(1, Vh), p["gln1_b"].reshape(1, Vh),
            p["gln2_g"].reshape(1, Vh), p["gln2_b"].reshape(1, Vh),
            jnp.asarray(p["prelu_a"], jnp.float32).reshape(1, 1)]

    def const(shape):
        return pl.BlockSpec(shape, lambda i: (0,) * len(shape))

    in_specs = [pl.BlockSpec((1, T, N), lambda i: (i, 0, 0)),
                const((N, Vh)), const((3, Vh)), const((Vh, N)),
                const((1, N)), const((1, N)),
                const((1, Vh)), const((1, Vh)),
                const((1, Vh)), const((1, Vh)),
                const((1, 1))]
    return pl.pallas_call(
        _visual_block_kernel(T, eps),
        out_shape=jax.ShapeDtypeStruct((M, T, N), jnp.float32),
        grid=(M,),
        in_specs=in_specs,
        out_specs=pl.BlockSpec((1, T, N), lambda i: (i, 0, 0)),
        compiler_params=_cparams(1),
    )(*args)


# ---------------------------------------------------------------------------
# 5. Dual-softmax cross attention: both streams computed in one kernel, heads
#    sliced in-register from the concatenated [qs|q|k|v] projection slabs
#    (no reshape_to/from_batches HBM transposes); single live score tensor.
# ---------------------------------------------------------------------------
def _cross_attn_kernel(L, d, F, head_num):
    scale = 1.0 / math.sqrt(d)
    dn = (((1,), (1,)), ((), ()))           # q @ k^T without materializing k^T

    def kernel(p1_ref, p2_ref, o1_ref, o2_ref):
        p1 = p1_ref[0]                      # (L, 4F) = [qs | q | k | v]
        p2 = p2_ref[0]

        def softmax(z):                     # f32 softmax
            z = z - jnp.max(z, axis=-1, keepdims=True)
            e = jnp.exp(z)
            return e * pl.reciprocal(jnp.sum(e, axis=-1, keepdims=True),
                                     approx=True)

        def head_attn(qs, qc, k, v):
            kb = k.astype(jnp.bfloat16)
            vb = v.astype(jnp.bfloat16)
            s_self = lax.dot_general(qs.astype(jnp.bfloat16), kb, dn,
                                     preferred_element_type=jnp.float32) * scale
            acc = jnp.dot(softmax(s_self).astype(jnp.bfloat16), vb,
                          preferred_element_type=jnp.float32)
            s_cross = lax.dot_general(qc.astype(jnp.bfloat16), kb, dn,
                                      preferred_element_type=jnp.float32) * scale
            acc = acc + jnp.dot(softmax(-s_cross).astype(jnp.bfloat16), vb,
                                preferred_element_type=jnp.float32)
            return acc * 0.5

        y1_heads, y2_heads = [], []
        for h in range(head_num):           # static unroll; TODO(synk): pad d
            lo, hi = h * d, (h + 1) * d
            y1_heads.append(head_attn(p1[:, lo:hi],                  # q1_self
                                      p2[:, F + lo:F + hi],          # q2 cross
                                      p1[:, 2 * F + lo:2 * F + hi],  # k1
                                      p1[:, 3 * F + lo:3 * F + hi])) # v1
            y2_heads.append(head_attn(p2[:, lo:hi],
                                      p1[:, F + lo:F + hi],
                                      p2[:, 2 * F + lo:2 * F + hi],
                                      p2[:, 3 * F + lo:3 * F + hi]))
        # lane-dense full-width stores
        o1_ref[0] = jnp.concatenate(y1_heads, axis=-1)
        o2_ref[0] = jnp.concatenate(y2_heads, axis=-1)
    return kernel


def cross_attention(proj1, proj2, head_num):
    Bn, L, F4 = proj1.shape
    F = F4 // 4
    d = F // head_num
    spec_in = pl.BlockSpec((1, L, F4), lambda b: (b, 0, 0))
    spec_out = pl.BlockSpec((1, L, F), lambda b: (b, 0, 0))
    return pl.pallas_call(
        _cross_attn_kernel(L, d, F, head_num),
        out_shape=(jax.ShapeDtypeStruct((Bn, L, F), jnp.float32),
                   jax.ShapeDtypeStruct((Bn, L, F), jnp.float32)),
        grid=(Bn,),
        in_specs=[spec_in, spec_in],
        out_specs=(spec_out, spec_out),
        compiler_params=_cparams(1),
    )(proj1, proj2)


# ---------------------------------------------------------------------------
# 6. Bi-LSTM (time-major): fused dual-direction input projection, in-kernel
#    recurrence with W_hh resident in VMEM, fused hf@W1 + hb@W2 output Linear.
# ---------------------------------------------------------------------------
def lstm_input_proj(x2d, Wf, bf, Wb, bb):
    """x2d: [R, D] -> (gxf, gxb) each [R, 4H]; one read of x, two bf16 dots."""
    R, D = x2d.shape
    G = Wf.shape[1]
    tm = R if R <= _ROW_TILE else _ROW_TILE

    def kernel(a_ref, wf_ref, bf_ref, wb_ref, bb_ref, of_ref, ob_ref):
        a = a_ref[...].astype(jnp.bfloat16)
        of_ref[...] = jnp.dot(a, wf_ref[...].astype(jnp.bfloat16),
                              preferred_element_type=jnp.float32) + bf_ref[...]
        ob_ref[...] = jnp.dot(a, wb_ref[...].astype(jnp.bfloat16),
                              preferred_element_type=jnp.float32) + bb_ref[...]

    return pl.pallas_call(
        kernel,
        out_shape=(jax.ShapeDtypeStruct((R, G), jnp.float32),
                   jax.ShapeDtypeStruct((R, G), jnp.float32)),
        grid=(pl.cdiv(R, tm),),
        in_specs=[pl.BlockSpec((tm, D), lambda i: (i, 0)),
                  pl.BlockSpec((D, G), lambda i: (0, 0)),
                  pl.BlockSpec((1, G), lambda i: (0, 0)),
                  pl.BlockSpec((D, G), lambda i: (0, 0)),
                  pl.BlockSpec((1, G), lambda i: (0, 0))],
        out_specs=(pl.BlockSpec((tm, G), lambda i: (i, 0)),
                   pl.BlockSpec((tm, G), lambda i: (i, 0))),
        compiler_params=_cparams(1),
    )(x2d, Wf, bf.reshape(1, G), Wb, bb.reshape(1, G))


def lstm_output_proj(hf2d, hb2d, W1, W2, b):
    """y = hf @ W[:H] + hb @ W[H:] + b   (replaces concat + Linear)."""
    R, H = hf2d.shape
    C = W1.shape[1]
    tm = R if R <= _ROW_TILE else _ROW_TILE

    def kernel(a_ref, b_ref, w1_ref, w2_ref, bias_ref, o_ref):
        acc = jnp.dot(a_ref[...].astype(jnp.bfloat16),
                      w1_ref[...].astype(jnp.bfloat16),
                      preferred_element_type=jnp.float32)
        acc = acc + jnp.dot(b_ref[...].astype(jnp.bfloat16),
                            w2_ref[...].astype(jnp.bfloat16),
                            preferred_element_type=jnp.float32)
        o_ref[...] = acc + bias_ref[...]

    return pl.pallas_call(
        kernel,
        out_shape=jax.ShapeDtypeStruct((R, C), jnp.float32),
        grid=(pl.cdiv(R, tm),),
        in_specs=[pl.BlockSpec((tm, H), lambda i: (i, 0)),
                  pl.BlockSpec((tm, H), lambda i: (i, 0)),
                  pl.BlockSpec((H, C), lambda i: (0, 0)),
                  pl.BlockSpec((H, C), lambda i: (0, 0)),
                  pl.BlockSpec((1, C), lambda i: (0, 0))],
        out_specs=pl.BlockSpec((tm, C), lambda i: (i, 0)),
        compiler_params=_cparams(1),
    )(hf2d, hb2d, W1, W2, b.reshape(1, C))


def _lstm_rec_kernel(T, H):
    def kernel(gxf_ref, gxb_ref, whf_ref, whb_ref, hf_out, hb_out,
               hf_s, cf_s, hb_s, cb_s):
        whf = whf_ref[...]        # bf16, resident across the whole time loop
        whb = whb_ref[...]
        hf_s[...] = jnp.zeros_like(hf_s)
        cf_s[...] = jnp.zeros_like(cf_s)
        hb_s[...] = jnp.zeros_like(hb_s)
        cb_s[...] = jnp.zeros_like(cb_s)

        def gates(pre):           # f32 nonlinearities (v5e: no bf16 VPU/EUP)
            i = jax.nn.sigmoid(pre[:, 0:H])
            f = jax.nn.sigmoid(pre[:, H:2 * H])
            g = jnp.tanh(pre[:, 2 * H:3 * H])
            o = jax.nn.sigmoid(pre[:, 3 * H:4 * H])
            return i, f, g, o

        @pl.loop(0, T)
        def _(t):
            # forward direction
            pre = gxf_ref[t] + jnp.dot(hf_s[...].astype(jnp.bfloat16), whf,
                                       preferred_element_type=jnp.float32)
            i, f, g, o = gates(pre)
            c = f * cf_s[...] + i * g
            h = o * jnp.tanh(c)
            cf_s[...] = c
            hf_s[...] = h
            hf_out[t] = h
            # backward direction (reversed time index); fwd/bwd matmuls
            # interleave inside one iteration to hide MXU latency.
            tb = T - 1 - t
            pre_b = gxb_ref[tb] + jnp.dot(hb_s[...].astype(jnp.bfloat16), whb,
                                          preferred_element_type=jnp.float32)
            ib, fb, gb, ob = gates(pre_b)
            cbv = fb * cb_s[...] + ib * gb
            hbv = ob * jnp.tanh(cbv)
            cb_s[...] = cbv
            hb_s[...] = hbv
            hb_out[tb] = hbv
    return kernel


def bilstm_linear(x_tm, lp, W1, W2, b_out):
    """x_tm: [T, Bn, D] time-major -> [T, Bn, C]; bi-LSTM + fused output Linear."""
    T, Bn, D = x_tm.shape
    H = lp["W_hh_f"].shape[0]

    gxf, gxb = lstm_input_proj(x_tm.reshape(T * Bn, D),
                               lp["W_ih_f"], lp["b_f"],
                               lp["W_ih_b"], lp["b_b"])
    gxf = gxf.reshape(T, Bn, 4 * H)
    gxb = gxb.reshape(T, Bn, 4 * H)

    bt = _batch_tile(Bn)
    hf, hb = pl.pallas_call(
        _lstm_rec_kernel(T, H),
        out_shape=(jax.ShapeDtypeStruct((T, Bn, H), jnp.float32),
                   jax.ShapeDtypeStruct((T, Bn, H), jnp.float32)),
        grid=(Bn // bt,),
        in_specs=[pl.BlockSpec((T, bt, 4 * H), lambda i: (0, i, 0)),
                  pl.BlockSpec((T, bt, 4 * H), lambda i: (0, i, 0)),
                  pl.BlockSpec((H, 4 * H), lambda i: (0, 0)),
                  pl.BlockSpec((H, 4 * H), lambda i: (0, 0))],
        out_specs=(pl.BlockSpec((T, bt, H), lambda i: (0, i, 0)),
                   pl.BlockSpec((T, bt, H), lambda i: (0, i, 0))),
        scratch_shapes=[pltpu.VMEM((bt, H), jnp.float32)] * 4,
        compiler_params=_cparams(1),
    )(gxf, gxb, lp["W_hh_f"], lp["W_hh_b"])

    y = lstm_output_proj(hf.reshape(T * Bn, H), hb.reshape(T * Bn, H),
                         W1, W2, b_out)
    return y.reshape(T, Bn, -1)


# ---------------------------------------------------------------------------
# Plain-JAX glue (pure data movement / index math)
# ---------------------------------------------------------------------------
def linear_interp_cl(v, out_len):
    """F.interpolate(mode='linear', align_corners=False); v channels-last [M,T,C]."""
    M, T, C = v.shape
    scale = T / out_len
    j = jnp.arange(out_len, dtype=jnp.float32)
    src = jnp.clip((j + 0.5) * scale - 0.5, 0.0, T - 1)
    i0 = jnp.floor(src).astype(jnp.int32)
    i1 = jnp.minimum(i0 + 1, T - 1)
    w = (src - i0.astype(jnp.float32))[None, :, None]
    return v[:, i0, :] * (1.0 - w) + v[:, i1, :] * w


def segmentation(x, K):
    Bn, N, L = x.shape
    P = K // 2
    gap = K - (P + L % K) % K
    if gap > 0:
        x = jnp.concatenate([x, jnp.zeros((Bn, N, gap), x.dtype)], axis=2)
    pad = jnp.zeros((Bn, N, P), x.dtype)
    x = jnp.concatenate([pad, x, pad], axis=2)
    x1 = x[:, :, :-P].reshape(Bn, N, -1, K)
    x2 = x[:, :, P:].reshape(Bn, N, -1, K)
    out = jnp.concatenate([x1, x2], axis=3).reshape(Bn, N, -1, K).transpose(0, 1, 3, 2)
    return out, gap


def over_add(x, gap):
    Bn, N, K, S = x.shape
    P = K // 2
    x = x.transpose(0, 1, 3, 2).reshape(Bn, N, -1, K * 2)
    x1 = x[:, :, :, :K].reshape(Bn, N, -1)[:, :, P:]
    x2 = x[:, :, :, K:].reshape(Bn, N, -1)[:, :, :-P]
    out = x1 + x2
    if gap > 0:
        out = out[:, :, :-gap]
    return out


# ---------------------------------------------------------------------------
# Modules
# ---------------------------------------------------------------------------
def cross_layer(x1, x2, p, head_num=4):
    """Cross_layer: training-mode BatchNorm folded as an in-kernel per-feature
    affine prologue of the pre-concatenated QKV(+self-Q) projection."""

    def folded_proj(x, g, b, W, bias):
        # BN stats in f32 (biased variance, training mode, eps=1e-5)
        m = jnp.mean(x, axis=(0, 1))
        var = jnp.mean(jnp.square(x - m), axis=(0, 1))
        s = g * lax.rsqrt(var + 1e-5)
        t = b - m * s
        return linear(x, W, bias, act="relu", scale=s, shift=t)   # [Bn, L, 16D]

    proj1 = folded_proj(x1, p["bn1_g"], p["bn1_b"], p["Wqkv1"], p["bqkv1"])
    proj2 = folded_proj(x2, p["bn2_g"], p["bn2_b"], p["Wqkv2"], p["bqkv2"])

    y1, y2 = cross_attention(proj1, proj2, head_num)
    y1 = linear(y1, p["W_o1"], p["b_o1"], act="relu")
    y2 = linear(y2, p["W_o2"], p["b_o2"], act="relu")
    return y1, y2


def cross_block(x_s, x_n, p):
    M, D, K, S = x_s.shape
    s = x_s.transpose(0, 3, 2, 1).reshape(M * S, K, D)
    n = x_n.transpose(0, 3, 2, 1).reshape(M * S, K, D)
    s, n = cross_layer(s, n, p["inter"])
    s = s.reshape(M, S, K, D).transpose(0, 3, 2, 1).reshape(M, D, K * S)
    n = n.reshape(M, S, K, D).transpose(0, 3, 2, 1).reshape(M, D, K * S)
    x_s = gln_add(s, x_s.reshape(M, D, K * S),
                  p["inter_ns_g"], p["inter_ns_b"]).reshape(M, D, K, S)
    x_n = gln_add(n, x_n.reshape(M, D, K * S),
                  p["inter_nn_g"], p["inter_nn_b"]).reshape(M, D, K, S)

    s = x_s.transpose(0, 2, 3, 1).reshape(M * K, S, D)
    n = x_n.transpose(0, 2, 3, 1).reshape(M * K, S, D)
    s, n = cross_layer(s, n, p["intra"])
    s = s.reshape(M, K, S, D).transpose(0, 3, 1, 2).reshape(M, D, K * S)
    n = n.reshape(M, K, S, D).transpose(0, 3, 1, 2).reshape(M, D, K * S)
    out_s = gln_add(s, x_s.reshape(M, D, K * S),
                    p["intra_ns_g"], p["intra_ns_b"]).reshape(M, D, K, S)
    out_n = gln_add(n, x_n.reshape(M, D, K * S),
                    p["intra_nn_g"], p["intra_nn_b"]).reshape(M, D, K, S)
    return out_s, out_n


def rnn_block(x, p):
    M, D, K, S = x.shape
    # ---- intra (time = K, batch = M*S), time-major layout fed directly ----
    xt = jnp.transpose(x, (2, 0, 3, 1)).reshape(K, M * S, D)
    y = bilstm_linear(xt, p["intra_lstm"],
                      p["intra_lin_Wf"], p["intra_lin_Wb"], p["intra_lin_b"])
    y = jnp.transpose(y.reshape(K, M, S, D), (1, 3, 0, 2)).reshape(M, D, K * S)
    intra = gln_add(y, x.reshape(M, D, K * S),
                    p["intra_norm_g"], p["intra_norm_b"])
    intra4 = intra.reshape(M, D, K, S)

    # ---- inter (time = S, batch = M*K) ----
    xt = jnp.transpose(intra4, (3, 0, 2, 1)).reshape(S, M * K, D)
    y = bilstm_linear(xt, p["inter_lstm"],
                      p["inter_lin_Wf"], p["inter_lin_Wb"], p["inter_lin_b"])
    y = jnp.transpose(y.reshape(S, M, K, D), (1, 3, 2, 0)).reshape(M, D, K * S)
    out = gln_add(y, intra, p["inter_norm_g"], p["inter_norm_b"])
    return out.reshape(M, D, K, S)


def adder(x, gap, p):
    x = over_add(x, gap)                                      # [M, B, P]
    # PReLU prologue + 1x1 mask conv + ReLU epilogue fused into one kernel.
    return conv1x1_cf(x, p["mask_Wt"], prelu_alpha=p["prelu_a"], relu=True)


def extractor_forward(x, visual, params, Kseg, R):
    M, N, P = x.shape

    # ---- visual path: channels-last end-to-end, fully fused VisualConv1D ----
    v = linear(visual, params["v_ds_W"])                      # [M, Tv, N]
    for sp in params["v_conv"]:
        v = visual_block(v, sp)
    v = linear_interp_cl(v, P)                                # [M, P, N]
    v = jnp.transpose(v, (0, 2, 1))                           # [M, N, P]

    # ---- audio bottleneck: gLN fused into the bottleneck 1x1 conv ----
    xx = conv1x1_cf(x, params["bottleneck_Wt"],
                    gln=(params["ln_g"], params["ln_b"]), eps=1e-8)   # [M, B, P]
    xx = jnp.concatenate([xx, v], axis=1)                     # [M, B+N, P]
    xx = conv1x1_cf(xx, params["av_Wt"])                      # [M, B, P]

    seg, gap = segmentation(xx, Kseg)                         # [M, B, K, S]

    all_s, all_n = [], []
    x_s = rnn_block(seg, params["rnn_s"][0])
    x_n = rnn_block(seg, params["rnn_n"][0])
    all_s.append(adder(x_s, gap, params["adder"]))
    all_n.append(adder(x_n, gap, params["adder"]))
    for i in range(1, R):
        x_s, x_n = cross_block(x_s, x_n, params["cross"][i])
        x_s = rnn_block(x_s, params["rnn_s"][i])
        x_n = rnn_block(x_n, params["rnn_n"][i])
        all_s.append(adder(x_s, gap, params["adder"]))
        all_n.append(adder(x_n, gap, params["adder"]))
    return all_s, all_n


# ---------------------------------------------------------------------------
# Deterministic parameter init (synthetic; shapes follow Extractor.__init__).
# Layout decisions hoisted here: MXU weights bf16, channels-first conv weights
# pre-transposed [Cout,Cin], QKV pre-concatenated, LSTM output Linear pre-split.
# ---------------------------------------------------------------------------
class _KeyGen:
    def __init__(self, seed):
        self._key = jax.random.PRNGKey(seed)

    def __call__(self):
        self._key, sub = jax.random.split(self._key)
        return sub


def init_params(N, Bc, H, R, seed=42, n_stacks=5, Vh=512):
    kg = _KeyGen(seed)

    def Wm(*shape, scale=0.1):          # MXU weight -> bf16
        return (jax.random.normal(kg(), shape, jnp.float32) * scale
                ).astype(jnp.bfloat16)

    def Wf(*shape, scale=0.1):          # VPU / bias param -> f32
        return jax.random.normal(kg(), shape, jnp.float32) * scale

    ones = lambda c: jnp.ones((c,), jnp.float32)
    zeros = lambda c: jnp.zeros((c,), jnp.float32)

    def lstm_p(in_dim):
        return {"W_ih_f": Wm(in_dim, 4 * H), "W_hh_f": Wm(H, 4 * H),
                "b_f": Wf(4 * H, scale=0.05),
                "W_ih_b": Wm(in_dim, 4 * H), "W_hh_b": Wm(H, 4 * H),
                "b_b": Wf(4 * H, scale=0.05)}

    def rnn_p():
        return {"intra_lstm": lstm_p(Bc), "inter_lstm": lstm_p(Bc),
                # Linear(2H, Bc) pre-split into fwd/bwd halves
                "intra_lin_Wf": Wm(H, Bc), "intra_lin_Wb": Wm(H, Bc),
                "intra_lin_b": Wf(Bc, scale=0.05),
                "inter_lin_Wf": Wm(H, Bc), "inter_lin_Wb": Wm(H, Bc),
                "inter_lin_b": Wf(Bc, scale=0.05),
                "intra_norm_g": ones(Bc), "intra_norm_b": zeros(Bc),
                "inter_norm_g": ones(Bc), "inter_norm_b": zeros(Bc)}

    def cross_layer_p():
        # pre-concatenated [q_self | q | k | v] projection (each Bc -> 4*Bc)
        return {"Wqkv1": Wm(Bc, 16 * Bc), "bqkv1": Wf(16 * Bc, scale=0.05),
                "Wqkv2": Wm(Bc, 16 * Bc), "bqkv2": Wf(16 * Bc, scale=0.05),
                "W_o1": Wm(4 * Bc, Bc), "b_o1": Wf(Bc, scale=0.05),
                "W_o2": Wm(4 * Bc, Bc), "b_o2": Wf(Bc, scale=0.05),
                "bn1_g": ones(Bc), "bn1_b": zeros(Bc),
                "bn2_g": ones(Bc), "bn2_b": zeros(Bc)}

    def cross_p():
        return {"inter": cross_layer_p(), "intra": cross_layer_p(),
                "inter_ns_g": ones(Bc), "inter_ns_b": zeros(Bc),
                "inter_nn_g": ones(Bc), "inter_nn_b": zeros(Bc),
                "intra_ns_g": ones(Bc), "intra_ns_b": zeros(Bc),
                "intra_nn_g": ones(Bc), "intra_nn_b": zeros(Bc)}

    def vstack_p():
        return {"gln0_g": ones(N), "gln0_b": zeros(N),
                "conv1x1_W": Wm(N, Vh),
                "gln1_g": ones(Vh), "gln1_b": zeros(Vh),
                "ds_w": Wf(3, Vh),                          # [tap, channel], VPU
                "prelu_a": jnp.float32(0.25),
                "gln2_g": ones(Vh), "gln2_b": zeros(Vh),
                "pw_W": Wm(Vh, N)}

    return {"v_ds_W": Wm(512, N),
            "ln_g": ones(N), "ln_b": zeros(N),
            "bottleneck_Wt": Wm(Bc, N),      # pre-transposed [Cout, Cin]
            "av_Wt": Wm(Bc, Bc + N),
            "v_conv": [vstack_p() for _ in range(n_stacks)],
            "rnn_s": [rnn_p() for _ in range(R)],
            "rnn_n": [rnn_p() for _ in range(R)],
            "cross": [cross_p() for _ in range(R)],
            "adder": {"prelu_a": jnp.float32(0.25), "mask_Wt": Wm(N, Bc)}}


# ---------------------------------------------------------------------------
if __name__ == "__main__":
    # Extractor(N, L, B, H, K, R): small config (L is unused in forward).
    M, N, P = 2, 16, 32          # batch, encoder channels, audio time steps
    Bc, H, Kseg, R = 8, 8, 8, 2  # bottleneck, rnn hidden, segment len, repeats
    Tv = 4                       # visual frames (feature dim fixed at 512 by v_ds)

    key = jax.random.PRNGKey(0)
    kx, kv = jax.random.split(key)
    x = jax.random.normal(kx, (M, N, P), jnp.float32)
    visual = jax.random.normal(kv, (M, Tv, 512), jnp.float32)

    params = init_params(N, Bc, H, R)

    all_s, all_n = extractor_forward(x, visual, params, Kseg, R)
    jax.block_until_ready((all_s, all_n))

    assert len(all_s) == R and len(all_n) == R
    for t in all_s + all_n:
        assert t.shape == (M, N, P), t.shape
        assert bool(jnp.all(jnp.isfinite(t)))
    print("KERNEL_OK")
</pallas_src>

<mosaic_0001>
module attributes {stable_mosaic.version = 11 : i64} {
  func.func @kernel(%arg0: i32, %arg1: memref<8x512xf32, #tpu.memory_space<vmem>>, %arg2: memref<512x16xbf16, #tpu.memory_space<vmem>>, %arg3: memref<8x16xf32, #tpu.memory_space<vmem>>) attributes {dimension_semantics = [#tpu.dimension_semantics<parallel>], iteration_bounds = array<i64: 1>, scalar_prefetch = 0 : i64, scratch_operands = 0 : i64, tpu.core_type = #tpu.core_type<tc>, window_params = [{transform_indices = @transform_0, window_bounds = array<i64: 8, 512>}, {pipeline_mode = #tpu.pipeline_mode<synchronous>, transform_indices = @transform_1, window_bounds = array<i64: 512, 16>}, {transform_indices = @transform_2, window_bounds = array<i64: 8, 16>}]} {
    %c0 = arith.constant 0 : index
    %c0_0 = arith.constant 0 : index
    %0 = vector.load %arg1[%c0, %c0_0] : memref<8x512xf32, #tpu.memory_space<vmem>>, vector<8x512xf32>
    %1 = arith.truncf %0 : vector<8x512xf32> to vector<8x512xbf16>
    %c0_1 = arith.constant 0 : index
    %c0_2 = arith.constant 0 : index
    %2 = vector.load %arg2[%c0_1, %c0_2] : memref<512x16xbf16, #tpu.memory_space<vmem>>, vector<512x16xbf16>
    %cst = arith.constant dense<0.000000e+00> : vector<8x16xf32>
    %3 = tpu.matmul %1, %2, %cst {dimension_numbers = #tpu.dot_dimension_numbers<[1], [0], [0], [1], [0, 0, 1, 1], [], []>} : vector<8x512xbf16>, vector<512x16xbf16>, vector<8x16xf32> -> vector<8x16xf32>
    %c0_3 = arith.constant 0 : index
    %c0_4 = arith.constant 0 : index
    %4 = vector.load %arg3[%c0_3, %c0_4] : memref<8x16xf32, #tpu.memory_space<vmem>>, vector<8x16xf32>
    tpu.vector_store %arg3[%c0_3, %c0_4], %3 {strides = array<i32>} : memref<8x16xf32, #tpu.memory_space<vmem>>, vector<8x16xf32>,
    return
  }
  func.func @transform_0(%arg0: i32) -> (i32, i32) {
    %c0_i32 = arith.constant 0 : i32
    %c0_i32_0 = arith.constant 0 : i32
    return %arg0, %c0_i32 : i32, i32
  }
  func.func @transform_1(%arg0: i32) -> (i32, i32) {
    %c0_i32 = arith.constant 0 : i32
    %c0_i32_0 = arith.constant 0 : i32
    %c0_i32_1 = arith.constant 0 : i32
    return %c0_i32, %c0_i32_0 : i32, i32
  }
  func.func @transform_2(%arg0: i32) -> (i32, i32) {
    %c0_i32 = arith.constant 0 : i32
    %c0_i32_0 = arith.constant 0 : i32
    return %arg0, %c0_i32 : i32, i32
  }
}

</mosaic_0001>

<bundles_post_ra>
// kernel: tpu_custom_call.1
= control target key start
LH: loop header
LB: loop body
LE: loop exit
PB: predicated region body
PF: predicated region fallthrough
CT: control target
= control target key end

     0   :  { %7 = vsyncpa [#allocation3], 0  ;;  %s649_s0 = inlined_call_operand.hbm [shape: f32[8,512], index: 0, kind: input, shape index: {}]   ;;  %s650_s1 = inlined_call_operand.hbm [shape: bf16[512,16], index: 1, kind: input, shape index: {}]   ;;  %s651_s2 = inlined_call_operand.hbm [shape: f32[8,16], index: 2, kind: output, shape index: {}]  }
   0x1   :  { %8 = vsyncpa [#allocation6], 0 }
   0x2   :  { %9 = vsyncpa [#allocation4], 0  ;;  %s586_s9 = smov [#allocation2]   ;;  %s587_s11 = smov [#allocation5]  }
   0x3   :  { %s16_s10 = sshll.u32 %s586_s9, 4  ;;  %s25_s12 = sshll.u32 %s587_s11, 4  ;;  %s17_s10 = int_to_ptr.vmem [resolvable:$true] %s16_s10  ;;  %s606_s12 = int_to_ptr.vmem [resolvable:$true] %s25_s12 }
   0x4   :  { %s514_s15 = scalar_lea.hbm %s649_s0, 512 }
   0x5   :  { %p515_p0 = scmp.ne.s32.totalorder %s649_s0, %s514_s15  ;;  %p518_p1 = scmp.lt.u32.totalorder %s514_s15, %s649_s0 }
   0x7   :  { %p520_p2 = pnand %p518_p1, %p515_p0 }
   0x9   :  { %523 = shalt.err (!%p520_p2)
}
   0xa   :  { %s524_s20 = scalar_lea.vmem %s17_s10, 512  ;;  %p529_p4 = scmp.lt.s32.totalorder %s17_s10, %s17_s10 }
   0xb   :  { %p525_p3 = scmp.ne.s32.totalorder %s17_s10, %s524_s20  ;;  %p530_p5 = scmp.lt.s32.totalorder %s524_s20, %s524_s20 }
   0xd   :  { %p531_p6 = por %p530_p5, %p529_p4 }
   0xf   :  { %p532_p7 = pnand %p531_p6, %p525_p3 }
  0x11   :  { %535 = shalt.err (!%p532_p7)
}
  0x12   :  { %19 = dma.hbm_to_vmem [thread:$0]  %s649_s0, 512, %s17_s10, [#allocation3]  }
  0x13   :  { %s536_s25 = scalar_lea.hbm %s650_s1, 4096 }
  0x14   :  { %p537_p8 = scmp.ne.s32.totalorder %s650_s1, %s536_s25  ;;  %p540_p9 = scmp.lt.u32.totalorder %s536_s25, %s650_s1 }
  0x16   :  { %p542_p10 = pnand %p540_p9, %p537_p8 }
  0x18   :  { %545 = shalt.err (!%p542_p10)
}
  0x19   :  { %s546_s30 = scalar_lea.vmem %s606_s12, 4096  ;;  %p551_p12 = scmp.lt.s32.totalorder %s606_s12, %s606_s12 }
  0x1a   :  { %p547_p11 = scmp.ne.s32.totalorder %s606_s12, %s546_s30  ;;  %p552_p13 = scmp.lt.s32.totalorder %s546_s30, %s546_s30 }
  0x1c   :  { %p553_p0 = por %p552_p13, %p551_p12 }
  0x1e   :  { %p554_p1 = pnand %p553_p0, %p547_p11 }
  0x20   :  { %557 = shalt.err (!%p554_p1)
}
  0x21   :  { %s588_s0 = smov 64   ;;  %s589_s3 = smov 4  }
  0x22   :  { %31 = dma.hbm_to_vmem [thread:$0]  %s650_s1, 4096, %s606_s12, [#allocation6], %s588_s0, %s588_s0, %s589_s3  }
  0x23   :  { %580 = dma.done.wait [#allocation3], 512  }
  0x24   :  { %581 = vsyncadd [#allocation3], 4294966784 }
  0x25   :  { %582 = dma.done.wait [#allocation6], 4096  }
  0x26   :  { %583 = vsyncadd [#allocation6], 4294963200  ;;  %v482_v0 = vld [vmem:[#allocation5 + $0x40] sm:$0xff]   ;;  %v486_v4 = vld [vmem:[#allocation5 + $0x48] sm:$0xff]   ;;  %s590_s1 = smov [#allocation7]   ;;  %vm383_vm0 = vcmask 130048  }
  0x27   :  { %v483_v1 = vld [vmem:[#allocation5 + $0xc0] sm:$0xff]   ;;  %433 = vmatprep.subr.bf16.mxu0 %v482_v0  ;;  %v487_v5 = vld [vmem:[#allocation5 + $0xc8] sm:$0xff]   ;;  %v490_v8 = vld [vmem:[#allocation5 + $0x50] sm:$0xff]   ;;  %s391_s6 = sshll.u32 %s590_s1, 4  ;;  %s392_s6 = int_to_ptr.vmem [resolvable:$true] %s391_s6 }
  0x28   :  { %v484_v2 = vld [vmem:[#allocation5] sm:$0xff]   ;;  %455 = vmatprep.subr.bf16.mxu1 %v483_v1  ;;  %v488_v6 = vld [vmem:[#allocation5 + $0x8] sm:$0xff]   ;;  %v491_v9 = vld [vmem:[#allocation5 + $0xd0] sm:$0xff]   ;;  %s558_s7 = scalar_lea.vmem %s392_s6, 128  ;;  %p563_p3 = scmp.lt.s32.totalorder %s392_s6, %s392_s6 }
  0x29   :  { %v485_v3 = vld [vmem:[#allocation5 + $0x80] sm:$0xff]   ;;  %434 = vmatpush3.bf16.msra.mxu0 %v484_v2  ;;  %v489_v7 = vld [vmem:[#allocation5 + $0x88] sm:$0xff]   ;;  %v492_v10 = vld [vmem:[#allocation5 + $0x10] sm:$0xff]   ;;  %p559_p2 = scmp.ne.s32.totalorder %s392_s6, %s558_s7  ;;  %p564_p4 = scmp.lt.s32.totalorder %s558_s7, %s558_s7 }
  0x2a   :  { %456 = vmatpush3.bf16.msra.mxu1 %v485_v3  ;;  %435 = vmatprep.subr.bf16.mxu0 %v486_v4  ;;  %v493_v11 = vld [vmem:[#allocation5 + $0x90] sm:$0xff]   ;;  %v494_v12 = vld [vmem:[#allocation5 + $0x58] sm:$0xff]   ;;  %v498_v16 = vld [vmem:[#allocation5 + $0x60] sm:$0xff]  }
  0x2b   :  { %457 = vmatprep.subr.bf16.mxu1 %v487_v5  ;;  %v495_v13 = vld [vmem:[#allocation5 + $0xd8] sm:$0xff]   ;;  %v499_v17 = vld [vmem:[#allocation5 + $0xe0] sm:$0xff]   ;;  %v502_v20 = vld [vmem:[#allocation5 + $0x68] sm:$0xff]   ;;  %p565_p5 = por %p564_p4, %p563_p3 }
  0x2c   :  { %v496_v14 = vld [vmem:[#allocation5 + $0x18] sm:$0xff]   ;;  %v500_v18 = vld [vmem:[#allocation5 + $0x20] sm:$0xff]   ;;  %v503_v21 = vld [vmem:[#allocation5 + $0xe8] sm:$0xff]  }
  0x2d   :  { %436 = vmatpush3.bf16.msra.mxu0 %v488_v6  ;;  %v497_v15 = vld [vmem:[#allocation5 + $0x98] sm:$0xff]   ;;  %v501_v19 = vld [vmem:[#allocation5 + $0xa0] sm:$0xff]   ;;  %v504_v22 = vld [vmem:[#allocation5 + $0x28] sm:$0xff]   ;;  %p566_p6 = pnand %p565_p5, %p559_p2 }
  0x2e   :  { %458 = vmatpush3.bf16.msra.mxu1 %v489_v7  ;;  %437 = vmatprep.subr.bf16.mxu0 %v490_v8  ;;  %v505_v23 = vld [vmem:[#allocation5 + $0xa8] sm:$0xff]   ;;  %v506_v24 = vld [vmem:[#allocation5 + $0x70] sm:$0xff]   ;;  %v510_v28 = vld [vmem:[#allocation5 + $0x78] sm:$0xff]  }
  0x2f   :  { %459 = vmatprep.subr.bf16.mxu1 %v491_v9  ;;  %v507_v25 = vld [vmem:[#allocation5 + $0xf0] sm:$0xff]   ;;  %v511_v29 = vld [vmem:[#allocation5 + $0xf8] sm:$0xff]   ;;  %v40_v32 = vld [vmem:[#allocation2 + $0x8] sm:$0xff] }
  0x30   :  { %v508_v26 = vld [vmem:[#allocation5 + $0x30] sm:$0xff]   ;;  %v512_v30 = vld [vmem:[#allocation5 + $0x38] sm:$0xff]   ;;  %v39_v34 = vld [vmem:[#allocation2] sm:$0xff]  ;;  %v44_v35 = vpack.c.bf16 %v40_v32, %v40_v32 }
  0x31   :  { %438 = vmatpush3.bf16.msra.mxu0 %v492_v10  ;;  %v509_v27 = vld [vmem:[#allocation5 + $0xb0] sm:$0xff]   ;;  %v513_v31 = vld [vmem:[#allocation5 + $0xb8] sm:$0xff]   ;;  %v43_v37 = vpack.c.bf16 %v39_v34, %v39_v34 }
  0x32   :  { %460 = vmatpush3.bf16.msra.mxu1 %v493_v11  ;;  %439 = vmatprep.subr.bf16.mxu0 %v494_v12  ;;  %v42_v33 = vld [vmem:[#allocation2 + $0x18] sm:$0xff]  ;;  %v41_v38 = vld [vmem:[#allocation2 + $0x10] sm:$0xff] }
  0x33   :  { %461 = vmatprep.subr.bf16.mxu1 %v495_v13  ;;  %v46_v36 = vpack.c.bf16 %v42_v33, %v42_v33  ;;  %v45_v39 = vpack.c.bf16 %v41_v38, %v41_v38  ;;  %335 = vmatprep.mubr.bf16.mxu0 %v44_v35 }
  0x35   :  { %440 = vmatpush3.bf16.msra.mxu0 %v496_v14  ;;  %375 = vmatprep.mubr.bf16.mxu1 %v46_v36 }
  0x36   :  { %462 = vmatpush3.bf16.msra.mxu1 %v497_v15  ;;  %441 = vmatprep.subr.bf16.mxu0 %v498_v16 }
  0x37   :  { %463 = vmatprep.subr.bf16.mxu1 %v499_v17 }
  0x39   :  { %442 = vmatpush3.bf16.msra.mxu0 %v500_v18 }
  0x3a   :  { %464 = vmatpush3.bf16.msra.mxu1 %v501_v19  ;;  %443 = vmatprep.subr.bf16.mxu0 %v502_v20 }
  0x3b   :  { %465 = vmatprep.subr.bf16.mxu1 %v503_v21 }
  0x3d   :  { %444 = vmatpush3.bf16.msra.mxu0 %v504_v22 }
  0x3e   :  { %466 = vmatpush3.bf16.msra.mxu1 %v505_v23  ;;  %445 = vmatprep.subr.bf16.mxu0 %v506_v24 }
  0x3f   :  { %467 = vmatprep.subr.bf16.mxu1 %v507_v25 }
  0x41   :  { %446 = vmatpush3.bf16.msra.mxu0 %v508_v26 }
  0x42   :  { %468 = vmatpush3.bf16.msra.mxu1 %v509_v27  ;;  %447 = vmatprep.subr.bf16.mxu0 %v510_v28 }
  0x43   :  { %469 = vmatprep.subr.bf16.mxu1 %v511_v29 }
  0x45   :  { %448 = vmatpush3.bf16.msra.mxu0 %v512_v30 }
  0x46   :  { %470 = vmatpush3.bf16.msra.mxu1 %v513_v31 }
  0x48   :  { %336 = vmatmul.mubr.bf16.vlgmr.msra.gmra.mrb[0].mxu0 %v43_v37 }
  0x49   :  { %376 = vmatmul.mubr.bf16.vlgmr.msra.gmra.mrb[0].mxu1 %v45_v39 }
 0x11b   :  { %v449_v40 = vpop.f32.mrb[0].mxu0 }
 0x11c   :  { %v471_v41 = vpop.f32.mrb[0].mxu1  ;;  %v450_v42 = vpop.f32.mrb[1].mxu0 }
 0x11d   :  { %v472_v43 = vpop.f32.mrb[1].mxu1  ;;  %v451_v44 = vadd.f32 %v450_v42, %v449_v40  ;;  %v452_v46 = vpop.f32.mrb[2].mxu0 }
 0x11e   :  { %v473_v45 = vadd.f32 %v472_v43, %v471_v41  ;;  %v474_v47 = vpop.f32.mrb[2].mxu1  ;;  %v453_v48 = vpop.f32.mrb[3].mxu0 }
 0x11f   :  { %v475_v49 = vpop.f32.mrb[3].mxu1 }
 0x120   :  { %v378_v50 = vadd.f32 %v473_v45, %v451_v44 }
 0x122   :  { %384 = vst.msk [vmem:[#allocation7] sm:$0xff] %vm383_vm0, %v378_v50 }
 0x123   :  { %569 = shalt.err (!%p566_p6)
}
 0x124   :  { %s570_s10 = scalar_lea.hbm %s651_s2, 128 }
 0x125   :  { %p571_p7 = scmp.ne.s32.totalorder %s651_s2, %s570_s10  ;;  %p574_p8 = scmp.lt.u32.totalorder %s570_s10, %s651_s2 }
 0x127   :  { %p576_p9 = pnand %p574_p8, %p571_p7 }
 0x129   :  { %579 = shalt.err (!%p576_p9)
}
 0x12a   :  { %394 = dma.vmem_to_hbm [thread:$0]  %s392_s6, 128, %s651_s2, [#allocation4]  }
 0x12b   :  { %584 = dma.done.wait [#allocation4], 128  }
 0x12c   :  { %585 = vsyncadd [#allocation4], 4294967168 }
 0x12d   :  { %398 = vsyncpa [#allocation3], 1 }
 0x12e   :  { %399 = vsyncpa [#allocation6], 1 }
 0x12f   :  { %400 = vsyncpa [#allocation4], 1 }

</bundles_post_ra>
